<compile_context>
chip_gen: v7x
topology: tpu7x:2x2x1
jax: 0.10.0
libtpu: 0.0.40
codegen_flags: <defaults>
</compile_context>

<pallas_src>
import jax
import jax.numpy as jnp
from jax import lax
from jax.experimental import pallas as pl
from jax.experimental.pallas import tpu as pltpu


_VMEM_LIMIT_BYTES = 48 * 1024 * 1024   # safe on v7x (64 MiB/TC); fine on v5e/v6e
_VMEM_BUDGET_BYTES = 40 * 1024 * 1024  # target double-buffered tile footprint


def _round_up(x, m):
    return ((x + m - 1) // m) * m


def _largest_aligned_divisor(total, target, align):
    """Largest multiple of `align` that divides `total` and is <= max(target, align).

    `total` must itself be a multiple of `align`, so `align` always qualifies.
    """
    target = max(target, align)
    best = align
    d = align
    limit = min(target, total)
    while d <= limit:
        if total % d == 0:
            best = d
        d += align
    return best


def _tile_footprint_bytes(tm, tn, tk):
    # Double-buffered f32 tiles for x, W, bias, and the output.
    return 4 * (2 * tm * tk + 2 * tk * tn + 2 * tn + 2 * tm * tn)


def expert_kernel(x_ref, w_ref, b_ref, o_ref):
    # x_ref: (tm, tk)   activation tile
    # w_ref: (tk, tn)   weight tile, pre-transposed to [in, out]
    # b_ref: (1,  tn)   bias tile
    # o_ref: (tm, tn)   f32 output tile, resident across the K grid axis
    k = pl.program_id(2)

    @pl.when(k == 0)
    def _():
        o_ref[...] = jnp.zeros_like(o_ref)

    o_ref[...] += jnp.dot(x_ref[...], w_ref[...],
                          preferred_element_type=jnp.float32)

    @pl.when(k == pl.num_programs(2) - 1)
    def _():
        o_ref[...] = o_ref[...] + b_ref[...]


def make_expert(weight, bias, *, tm_target=512, tn_target=1024, tk_target=512):
    """One-time parameter prep; returns a jitted forward(x) -> x @ W.T + b.

    weight: [out_dim, in_dim]  (native nn.Linear layout)
    bias:   [out_dim]
    The weight is transposed to [in_dim, out_dim] and padded to 128 multiples
    ONCE here, so the per-call path only pads x (cheap) and launches the kernel.
    """
    out_dim, in_dim = weight.shape
    assert bias.shape == (out_dim,)

    Kp = _round_up(in_dim, 128)
    Np = _round_up(out_dim, 128)

    # Largest 128-aligned divisors of the padded dims -> no wasted tile passes.
    tn0 = _largest_aligned_divisor(Np, tn_target, 128)
    tk0 = _largest_aligned_divisor(Kp, tk_target, 128)

    wt = jnp.asarray(weight, jnp.float32).T            # [in_dim, out_dim]
    if (Kp, Np) != (in_dim, out_dim):
        wt = jnp.pad(wt, ((0, Kp - in_dim), (0, Np - out_dim)))
    bp = jnp.asarray(bias, jnp.float32)
    if Np != out_dim:
        bp = jnp.pad(bp, (0, Np - out_dim))
    bp = bp.reshape(1, Np)

    # TODO(synk): optional bf16 weight/activation path (3-4x MXU rate, half the
    # HBM bytes) once the accuracy budget for the MoE is confirmed.

    def _forward(x):
        orig_shape = x.shape
        x2 = x.reshape(-1, in_dim)          # handle arbitrary leading dims
        B = x2.shape[0]

        tm = min(tm_target, _round_up(B, 8))
        tn = tn0
        tk = tk0
        Mp = _round_up(B, tm)

        # v7x megacore: keep the parallel (M, N) grid extent >= 2 when possible
        # so both TensorCores get output tiles.
        if (Mp // tm) * (Np // tn) == 1:
            if Np >= 256:
                tn = _largest_aligned_divisor(Np, max(128, tn // 2), 128)
            elif _round_up(B, 8) >= 16:
                tm = _round_up(max(8, tm // 2), 8)
                Mp = _round_up(B, tm)

        # Keep the double-buffered footprint inside the VMEM budget.
        while _tile_footprint_bytes(tm, tn, tk) > _VMEM_BUDGET_BYTES and tk > 128:
            tk = _largest_aligned_divisor(Kp, max(128, tk // 2), 128)
        while _tile_footprint_bytes(tm, tn, tk) > _VMEM_BUDGET_BYTES and tn > 128:
            tn = _largest_aligned_divisor(Np, max(128, tn // 2), 128)

        if Mp != B or Kp != in_dim:
            x2 = jnp.pad(x2, ((0, Mp - B), (0, Kp - in_dim)))

        grid = (Mp // tm, Np // tn, Kp // tk)

        cost = pl.CostEstimate(
            flops=2 * Mp * Np * Kp,
            transcendentals=0,
            bytes_accessed=4 * (Mp * Kp + Kp * Np + Mp * Np),
        )

        out = pl.pallas_call(
            expert_kernel,
            out_shape=jax.ShapeDtypeStruct((Mp, Np), jnp.float32),
            grid_spec=pltpu.PrefetchScalarGridSpec(
                num_scalar_prefetch=0,
                grid=grid,
                in_specs=[
                    pl.BlockSpec((tm, tk), lambda i, j, k: (i, k)),   # x tile
                    pl.BlockSpec((tk, tn), lambda i, j, k: (k, j)),   # W.T tile
                    pl.BlockSpec((1, tn), lambda i, j, k: (0, j)),    # bias tile
                ],
                out_specs=pl.BlockSpec((tm, tn), lambda i, j, k: (i, j)),
            ),
            compiler_params=pltpu.CompilerParams(
                dimension_semantics=("parallel", "parallel", "arbitrary"),
                vmem_limit_bytes=_VMEM_LIMIT_BYTES,
            ),
            cost_estimate=cost,
        )(x2, wt, bp)

        y = out[:B, :out_dim]
        return y.reshape(*orig_shape[:-1], out_dim)

    # TODO(synk): for the full MoE, stack expert weights into [E, in, out], add a
    # leading expert grid axis (size-1 / pl.Squeezed block on E) with
    # scalar-prefetched group offsets so one pallas_call amortizes launch and
    # per-step overhead across experts.
    return jax.jit(_forward)


if __name__ == "__main__":
    key = jax.random.PRNGKey(0)
    k_x, k_w, k_b, k_x2, k_w2, k_b2 = jax.random.split(key, 6)

    # ---- Small shapes matching the toy Expert(32 -> 16) ---------------------
    batch, input_dim, output_dim = 8, 32, 16
    bound = 1.0 / (input_dim ** 0.5)
    w = jax.random.uniform(k_w, (output_dim, input_dim),
                           minval=-bound, maxval=bound, dtype=jnp.float32)
    b = jax.random.uniform(k_b, (output_dim,),
                           minval=-bound, maxval=bound, dtype=jnp.float32)
    x = jax.random.normal(k_x, (batch, input_dim), dtype=jnp.float32)

    expert = make_expert(w, b)
    y = expert(x)
    jax.block_until_ready(y)

    y_ref = x @ w.T + b
    assert y.shape == (batch, output_dim)
    assert jnp.allclose(y, y_ref, atol=2e-2, rtol=2e-2), \
        float(jnp.max(jnp.abs(y - y_ref)))

    # ---- Medium shapes exercising the multi-tile (M, N, K) path -------------
    B2, in2, out2 = 256, 768, 512
    bound2 = 1.0 / (in2 ** 0.5)
    w2 = jax.random.uniform(k_w2, (out2, in2),
                            minval=-bound2, maxval=bound2, dtype=jnp.float32)
    b2 = jax.random.uniform(k_b2, (out2,),
                            minval=-bound2, maxval=bound2, dtype=jnp.float32)
    x2 = jax.random.normal(k_x2, (B2, in2), dtype=jnp.float32)

    expert2 = make_expert(w2, b2)
    y2 = expert2(x2)
    jax.block_until_ready(y2)

    y2_ref = jnp.dot(x2, w2.T, precision=lax.Precision.HIGHEST) + b2
    assert y2.shape == (B2, out2)
    assert jnp.allclose(y2, y2_ref, atol=2e-2, rtol=2e-2), \
        float(jnp.max(jnp.abs(y2 - y2_ref)))

    print("KERNEL_OK")
</pallas_src>

<mosaic_0001>
module attributes {stable_mosaic.version = 11 : i64} {
  func.func @expert_kernel(%arg0: i32, %arg1: i32, %arg2: i32, %arg3: memref<8x128xf32, #tpu.memory_space<vmem>>, %arg4: memref<128x128xf32, #tpu.memory_space<vmem>>, %arg5: memref<1x128xf32, #tpu.memory_space<vmem>>, %arg6: memref<8x128xf32, #tpu.memory_space<vmem>>) attributes {dimension_semantics = [#tpu.dimension_semantics<parallel>, #tpu.dimension_semantics<parallel>, #tpu.dimension_semantics<arbitrary>], iteration_bounds = array<i64: 1, 1, 1>, scalar_prefetch = 0 : i64, scratch_operands = 0 : i64, tpu.core_type = #tpu.core_type<tc>, window_params = [{transform_indices = @transform_0, window_bounds = array<i64: 8, 128>}, {transform_indices = @transform_1, window_bounds = array<i64: 128, 128>}, {transform_indices = @transform_2, window_bounds = array<i64: 1, 128>}, {transform_indices = @transform_3, window_bounds = array<i64: 8, 128>}]} {
    %c0_i32 = arith.constant 0 : i32
    %0 = arith.cmpi eq, %arg2, %c0_i32 : i32
    %1 = arith.extui %0 : i1 to i32
    %c0_i32_0 = arith.constant 0 : i32
    %2 = arith.cmpi ne, %1, %c0_i32_0 : i32
    scf.if %2 {
      %cst_10 = arith.constant 0.000000e+00 : f32
      %12 = vector.broadcast %cst_10 : f32 to vector<8x128xf32>
      %c0_11 = arith.constant 0 : index
      %c0_12 = arith.constant 0 : index
      %13 = vector.load %arg6[%c0_11, %c0_12] : memref<8x128xf32, #tpu.memory_space<vmem>>, vector<8x128xf32>
      tpu.vector_store %arg6[%c0_11, %c0_12], %12 {strides = array<i32>} : memref<8x128xf32, #tpu.memory_space<vmem>>, vector<8x128xf32>,
    } else {
    }
    %c0 = arith.constant 0 : index
    %c0_1 = arith.constant 0 : index
    %3 = vector.load %arg6[%c0, %c0_1] : memref<8x128xf32, #tpu.memory_space<vmem>>, vector<8x128xf32>
    %c0_2 = arith.constant 0 : index
    %c0_3 = arith.constant 0 : index
    %4 = vector.load %arg3[%c0_2, %c0_3] : memref<8x128xf32, #tpu.memory_space<vmem>>, vector<8x128xf32>
    %c0_4 = arith.constant 0 : index
    %c0_5 = arith.constant 0 : index
    %5 = vector.load %arg4[%c0_4, %c0_5] : memref<128x128xf32, #tpu.memory_space<vmem>>, vector<128x128xf32>
    %cst = arith.constant dense<0.000000e+00> : vector<8x128xf32>
    %6 = tpu.matmul %4, %5, %cst {dimension_numbers = #tpu.dot_dimension_numbers<[1], [0], [0], [1], [0, 0, 1, 1], [], []>} : vector<8x128xf32>, vector<128x128xf32>, vector<8x128xf32> -> vector<8x128xf32>
    %7 = arith.addf %3, %6 : vector<8x128xf32>
    %c0_6 = arith.constant 0 : index
    %c0_7 = arith.constant 0 : index
    %8 = vector.load %arg6[%c0_6, %c0_7] : memref<8x128xf32, #tpu.memory_space<vmem>>, vector<8x128xf32>
    tpu.vector_store %arg6[%c0_6, %c0_7], %7 {strides = array<i32>} : memref<8x128xf32, #tpu.memory_space<vmem>>, vector<8x128xf32>,
    %c0_i32_8 = arith.constant 0 : i32
    %9 = arith.cmpi eq, %arg2, %c0_i32_8 : i32
    %10 = arith.extui %9 : i1 to i32
    %c0_i32_9 = arith.constant 0 : i32
    %11 = arith.cmpi ne, %10, %c0_i32_9 : i32
    scf.if %11 {
      %c0_10 = arith.constant 0 : index
      %c0_11 = arith.constant 0 : index
      %12 = vector.load %arg6[%c0_10, %c0_11] : memref<8x128xf32, #tpu.memory_space<vmem>>, vector<8x128xf32>
      %c0_12 = arith.constant 0 : index
      %c0_13 = arith.constant 0 : index
      %13 = vector.load %arg5[%c0_12, %c0_13] : memref<1x128xf32, #tpu.memory_space<vmem>>, vector<1x128xf32>
      %14 = vector.broadcast %13 : vector<1x128xf32> to vector<8x128xf32>
      %15 = arith.addf %12, %14 : vector<8x128xf32>
      %c0_14 = arith.constant 0 : index
      %c0_15 = arith.constant 0 : index
      %16 = vector.load %arg6[%c0_14, %c0_15] : memref<8x128xf32, #tpu.memory_space<vmem>>, vector<8x128xf32>
      tpu.vector_store %arg6[%c0_14, %c0_15], %15 {strides = array<i32>} : memref<8x128xf32, #tpu.memory_space<vmem>>, vector<8x128xf32>,
    } else {
    }
    return
  }
  func.func @transform_0(%arg0: i32, %arg1: i32, %arg2: i32) -> (i32, i32) {
    %c0_i32 = arith.constant 0 : i32
    return %arg0, %arg2 : i32, i32
  }
  func.func @transform_1(%arg0: i32, %arg1: i32, %arg2: i32) -> (i32, i32) {
    %c0_i32 = arith.constant 0 : i32
    return %arg2, %arg1 : i32, i32
  }
  func.func @transform_2(%arg0: i32, %arg1: i32, %arg2: i32) -> (i32, i32) {
    %c0_i32 = arith.constant 0 : i32
    %c0_i32_0 = arith.constant 0 : i32
    return %c0_i32, %arg1 : i32, i32
  }
  func.func @transform_3(%arg0: i32, %arg1: i32, %arg2: i32) -> (i32, i32) {
    %c0_i32 = arith.constant 0 : i32
    return %arg0, %arg1 : i32, i32
  }
}

</mosaic_0001>

<bundles_post_ra>
// kernel: _forward.1
= control target key start
LH: loop header
LB: loop body
LE: loop exit
PB: predicated region body
PF: predicated region fallthrough
CT: control target
= control target key end

     0   :  { %8 = vsyncpa [#allocation3], 0  ;;  %s341_s0 = inlined_call_operand.vmem [shape: f32[8,128], index: 0, kind: input, shape index: {}]   ;;  %s342_s1 = inlined_call_operand.hbm [shape: f32[128,128], index: 1, kind: input, shape index: {}]   ;;  %s343_s2 = inlined_call_operand.vmem [shape: f32[1,128], index: 2, kind: input, shape index: {}]   ;;  %s344_s3 = inlined_call_operand.hbm [shape: f32[8,128], index: 3, kind: output, shape index: {}]  }
   0x1   :  { %9 = vsyncpa [#allocation4], 0  ;;  %s284_s12 = smov [#allocation2]   ;;  %s236_s16 = scalar_lea.hbm %s342_s1, 2048 }
   0x2   :  { %s17_s13 = sshll.u32 %s284_s12, 4  ;;  %p237_p0 = scmp.ne.s32.totalorder %s342_s1, %s236_s16  ;;  %s18_s13 = int_to_ptr.vmem [resolvable:$true] %s17_s13 }
   0x3   :  { %p240_p1 = scmp.lt.u32.totalorder %s236_s16, %s342_s1 }
   0x5   :  { %p242_p2 = pnand %p240_p1, %p237_p0 }
   0x7   :  { %245 = shalt.err (!%p242_p2)
}
   0x8   :  { %s246_s21 = scalar_lea.vmem %s18_s13, 2048  ;;  %p251_p4 = scmp.lt.s32.totalorder %s18_s13, %s18_s13 }
   0x9   :  { %p247_p3 = scmp.ne.s32.totalorder %s18_s13, %s246_s21  ;;  %p252_p5 = scmp.lt.s32.totalorder %s246_s21, %s246_s21 }
   0xb   :  { %p253_p6 = por %p252_p5, %p251_p4 }
   0xd   :  { %p254_p7 = pnand %p253_p6, %p247_p3 }
   0xf   :  { %257 = shalt.err (!%p254_p7)
}
  0x10   :  { %s285_s22 = smov 128   ;;  %s286_s23 = smov 8  }
  0x11   :  { %23 = dma.hbm_to_vmem [thread:$0]  %s342_s1, 2048, %s18_s13, [#allocation3], %s285_s22, %s285_s22, %s286_s23  }
  0x12   :  { %280 = dma.done.wait [#allocation3], 2048  }
  0x13   :  { %281 = vsyncadd [#allocation3], 4294965248  ;;  %v287_v0 = vmov 0.0|0.0   ;;  %vm288_vm0 = vmmov 0   ;;  %v289_v1 = vmov 0.0   ;;  %v36_v2 = vld [vmem:[#allocation2] sm:$0xff] }
  0x14   :  { %205 = vmatprep.subr.bf16.mxu0 %v287_v0  ;;  %202 = vmatprep.mubr.msk.f32.mxu0 %vm288_vm0, %v289_v1  ;;  %v37_v3 = vld [vmem:[#allocation2 + $0x8] sm:$0xff]  ;;  %v38_v4 = vld [vmem:[#allocation2 + $0x10] sm:$0xff]  ;;  %v39_v6 = vld [vmem:[#allocation2 + $0x18] sm:$0xff]  ;;  %s290_s29 = smov [#allocation5]  }
  0x15   :  { %v206_v5 = vpack.c.bf16 %v37_v3, %v36_v2  ;;  %v209_v7 = vpack.c.bf16 %v39_v6, %v38_v4  ;;  %v40_v8 = vld [vmem:[#allocation2 + $0x20] sm:$0xff]  ;;  %v41_v9 = vld [vmem:[#allocation2 + $0x28] sm:$0xff]  ;;  %v42_v11 = vld [vmem:[#allocation2 + $0x30] sm:$0xff]  ;;  %s143_s30 = sshll.u32 %s290_s29, 4  ;;  %s144_s30 = int_to_ptr.vmem [resolvable:$true] %s143_s30 }
  0x16   :  { %v212_v10 = vpack.c.bf16 %v41_v9, %v40_v8  ;;  %v43_v12 = vld [vmem:[#allocation2 + $0x38] sm:$0xff]  ;;  %v44_v14 = vld [vmem:[#allocation2 + $0x40] sm:$0xff]  ;;  %v45_v15 = vld [vmem:[#allocation2 + $0x48] sm:$0xff]  ;;  %s258_s4 = scalar_lea.vmem %s144_s30, 128  ;;  %p263_p9 = scmp.lt.s32.totalorder %s144_s30, %s144_s30 }
  0x17   :  { %207 = vmatpush3.bf16.msra.mxu0 %v206_v5  ;;  %v215_v13 = vpack.c.bf16 %v43_v12, %v42_v11  ;;  %v218_v16 = vpack.c.bf16 %v45_v15, %v44_v14  ;;  %v46_v17 = vld [vmem:[#allocation2 + $0x50] sm:$0xff]  ;;  %v47_v18 = vld [vmem:[#allocation2 + $0x58] sm:$0xff]  ;;  %v48_v20 = vld [vmem:[#allocation2 + $0x60] sm:$0xff]  ;;  %p259_p8 = scmp.ne.s32.totalorder %s144_s30, %s258_s4  ;;  %p264_p10 = scmp.lt.s32.totalorder %s258_s4, %s258_s4 }
  0x18   :  { %208 = vmatprep.subr.bf16.mxu0 %v287_v0  ;;  %v221_v19 = vpack.c.bf16 %v47_v18, %v46_v17  ;;  %v49_v21 = vld [vmem:[#allocation2 + $0x68] sm:$0xff]  ;;  %v50_v23 = vld [vmem:[#allocation2 + $0x70] sm:$0xff]  ;;  %v51_v24 = vld [vmem:[#allocation2 + $0x78] sm:$0xff] }
  0x19   :  { %v224_v22 = vpack.c.bf16 %v49_v21, %v48_v20  ;;  %v227_v25 = vpack.c.bf16 %v51_v24, %v50_v23  ;;  %v35_v26 = vld [vmem:[%s341_s0] sm:$0xff]  ;;  %p265_p11 = por %p264_p10, %p263_p9 }
  0x1a   :  { %v152_v28 = vld [vmem:[%s343_s2] ss:$0 sm:$0xff] }
  0x1b   :  { %210 = vmatpush3.bf16.msra.mxu0 %v209_v7  ;;  %p266_p12 = pnand %p265_p11, %p259_p8 }
  0x1c   :  { %211 = vmatprep.subr.bf16.mxu0 %v287_v0 }
  0x1f   :  { %213 = vmatpush3.bf16.msra.mxu0 %v212_v10 }
  0x20   :  { %214 = vmatprep.subr.bf16.mxu0 %v287_v0 }
  0x23   :  { %216 = vmatpush3.bf16.msra.mxu0 %v215_v13 }
  0x24   :  { %217 = vmatprep.subr.bf16.mxu0 %v287_v0 }
  0x27   :  { %219 = vmatpush3.bf16.msra.mxu0 %v218_v16 }
  0x28   :  { %220 = vmatprep.subr.bf16.mxu0 %v287_v0 }
  0x2b   :  { %222 = vmatpush3.bf16.msra.mxu0 %v221_v19 }
  0x2c   :  { %223 = vmatprep.subr.bf16.mxu0 %v287_v0 }
  0x2f   :  { %225 = vmatpush3.bf16.msra.mxu0 %v224_v22 }
  0x30   :  { %226 = vmatprep.subr.bf16.mxu0 %v287_v0 }
  0x33   :  { %228 = vmatpush3.bf16.msra.mxu0 %v227_v25 }
  0x36   :  { %203 = vmatmul.mubr.f32.vlgmr.msra.gmra.mrb[0].mxu0 %v35_v26 }
 0x109   :  { %v118_v27 = vpop.f32.mrb[0].mxu0 }
 0x10a   :  { %v204_v29 = vpop.f32.mrb[1].mxu0  ;;  %v135_v30 = vadd.f32 %v152_v28, %v118_v27 }
 0x10c   :  { %136 = vst [vmem:[#allocation5] sm:$0xff] %v135_v30 }
 0x10d   :  { %269 = shalt.err (!%p266_p12)
}
 0x10e   :  { %s270_s6 = scalar_lea.hbm %s344_s3, 128 }
 0x10f   :  { %p271_p13 = scmp.ne.s32.totalorder %s344_s3, %s270_s6  ;;  %p274_p0 = scmp.lt.u32.totalorder %s270_s6, %s344_s3 }
 0x111   :  { %p276_p1 = pnand %p274_p0, %p271_p13 }
 0x113   :  { %279 = shalt.err (!%p276_p1)
}
 0x114   :  { %146 = dma.vmem_to_hbm [thread:$0]  %s144_s30, 128, %s344_s3, [#allocation4]  }
 0x115   :  { %282 = dma.done.wait [#allocation4], 128  }
 0x116   :  { %283 = vsyncadd [#allocation4], 4294967168 }
 0x117   :  { %150 = vsyncpa [#allocation3], 1 }
 0x118   :  { %151 = vsyncpa [#allocation4], 1 }

</bundles_post_ra>
